<compile_context>
chip_gen: v7x
topology: tpu7x:2x2x1
jax: 0.10.0
libtpu: 0.0.40
codegen_flags: <defaults>
</compile_context>

<pallas_src>
import math

import jax
import jax.numpy as jnp
from jax.experimental import pallas as pl
from jax.experimental.pallas import tpu as pltpu

LANE = 128      # hidden feature padding (120 -> 128, 60 -> 128)
OUT_PAD = 8     # output feature padding (2 -> 8): minimal lane-masked store


def _round_up(n, m):
    return (n + m - 1) // m * m


def _choose_tile(B, tile_m):
    """Sublane-aligned batch tile with >=2 grid steps whenever B > 8
    (so v7x's two TensorCores both get work); never exceeds requested tile_m."""
    if B <= 8:
        return B                              # single block == full batch (legal)
    half = _round_up(-(-B // 2), 8)           # ceil(B/2) rounded up to sublane
    return max(8, min(tile_m, half))


def tongue_kernel(x_ref, w1_ref, w2_ref, w3_ref, b12_ref, b3_ref, o_ref):
    # Three back-to-back MXU matmuls with f32 accumulation; bias add + ReLU on
    # the VPU in f32. Eval-mode BN is pre-folded into w1/b1; dropout = identity.
    wdt = w1_ref.dtype
    x = x_ref[...].astype(wdt)

    h1 = jnp.dot(x, w1_ref[...], preferred_element_type=jnp.float32)
    h1 = jnp.maximum(h1 + b12_ref[0:1, :], 0.0)

    h2 = jnp.dot(h1.astype(wdt), w2_ref[...], preferred_element_type=jnp.float32)
    h2 = jnp.maximum(h2 + b12_ref[1:2, :], 0.0)

    h3 = jnp.dot(h2.astype(wdt), w3_ref[...], preferred_element_type=jnp.float32)
    o_ref[...] = (h3 + b3_ref[...]).astype(o_ref.dtype)


def tongue_model_forward(x, kp, *, tile_m=1024):
    """x: (B, F) float32 or bfloat16; kp: prepared params (prepare_kernel_params)."""
    B, F = x.shape
    tm = _choose_tile(B, tile_m)
    grid = (pl.cdiv(B, tm),)   # no host-side padding copy of x

    def const(shape):
        return pl.BlockSpec(shape, lambda i, _n=len(shape): (0,) * _n)

    xbytes = jnp.dtype(x.dtype).itemsize
    wbytes = sum(int(kp[k].size) * jnp.dtype(kp[k].dtype).itemsize
                 for k in ("w1", "w2", "w3", "b12", "b3"))
    cost = pl.CostEstimate(
        flops=2 * B * (F * LANE + LANE * LANE + LANE * OUT_PAD),
        transcendentals=0,
        bytes_accessed=B * (F * xbytes + OUT_PAD * 4) + wbytes,
    )

    out = pl.pallas_call(
        tongue_kernel,
        out_shape=jax.ShapeDtypeStruct((B, OUT_PAD), jnp.float32),
        grid=grid,
        in_specs=[
            pl.BlockSpec((tm, F), lambda i: (i, 0)),   # x: batch-tiled
            const(kp["w1"].shape),                     # weights pinned in VMEM
            const(kp["w2"].shape),
            const(kp["w3"].shape),
            const(kp["b12"].shape),                    # packed biases 1,2: (2, 128)
            const(kp["b3"].shape),                     # bias 3: (1, 8)
        ],
        out_specs=pl.BlockSpec((tm, OUT_PAD), lambda i: (i, 0)),
        compiler_params=pltpu.CompilerParams(
            dimension_semantics=("parallel",)),
        cost_estimate=cost,
    )(x, kp["w1"], kp["w2"], kp["w3"], kp["b12"], kp["b3"])

    return out[:, :kp["out_dim"]]


def prepare_kernel_params(raw, weight_dtype=jnp.float32):
    """Fold BN into fc1, transpose to (in,out), zero-pad (hidden->128, out->8)."""
    bn_scale = raw["gamma"] / jnp.sqrt(raw["run_var"] + raw["eps"])   # (F,)
    bn_shift = raw["beta"] - raw["run_mean"] * bn_scale               # (F,)

    # PyTorch Linear: y = x @ W.T + b, W is (out, in) -> transpose to (in, out).
    w1_t = raw["w1"].T            # (F, 120)
    w2_t = raw["w2"].T            # (120, 60)
    w3_t = raw["w3"].T            # (60, 2)

    # Exact eval-mode BN fold:
    #   (x*s + t) @ W1 + b1 == x @ (s[:,None]*W1) + (t @ W1 + b1)
    w1_f = w1_t * bn_scale[:, None]
    b1_f = bn_shift @ w1_t + raw["b1"]

    def pad2(w, rows, cols):
        return jnp.pad(w, ((0, rows - w.shape[0]), (0, cols - w.shape[1])))

    def pad1(b, cols):
        return jnp.pad(b, (0, cols - b.shape[0]))

    F = w1_t.shape[0]
    return {
        "w1": pad2(w1_f, F, LANE).astype(weight_dtype),
        "w2": pad2(w2_t, LANE, LANE).astype(weight_dtype),
        "w3": pad2(w3_t, LANE, OUT_PAD).astype(weight_dtype),
        "b12": jnp.stack([pad1(b1_f, LANE),
                          pad1(raw["b2"], LANE)]).astype(jnp.float32),
        "b3": pad1(raw["b3"], OUT_PAD)[None, :].astype(jnp.float32),
        "out_dim": raw["w3"].shape[0],
    }


def init_raw_params(key, input_size=512):
    """Deterministic synthetic parameters matching TongueModel.__init__ shapes."""
    ks = jax.random.split(key, 10)

    def linear(kw, kb, fan_in, fan_out):
        bound = 1.0 / math.sqrt(fan_in)
        w = jax.random.uniform(kw, (fan_out, fan_in), jnp.float32, -bound, bound)
        b = jax.random.uniform(kb, (fan_out,), jnp.float32, -bound, bound)
        return w, b

    w1, b1 = linear(ks[0], ks[1], input_size, 120)
    w2, b2 = linear(ks[2], ks[3], 120, 60)
    w3, b3 = linear(ks[4], ks[5], 60, 2)
    gamma = jax.random.uniform(ks[6], (input_size,), jnp.float32, 0.5, 1.5)
    beta = jax.random.uniform(ks[7], (input_size,), jnp.float32, -0.5, 0.5)
    run_mean = jax.random.uniform(ks[8], (input_size,), jnp.float32, -1.0, 1.0)
    run_var = jax.random.uniform(ks[9], (input_size,), jnp.float32, 0.5, 2.0)
    return {"w1": w1, "b1": b1, "w2": w2, "b2": b2, "w3": w3, "b3": b3,
            "gamma": gamma, "beta": beta,
            "run_mean": run_mean, "run_var": run_var, "eps": 1e-5}


def reference_forward(x, raw):
    """Pure-JAX eval-mode TongueModel forward (unfolded params)."""
    h = (x - raw["run_mean"]) / jnp.sqrt(raw["run_var"] + raw["eps"])
    h = h * raw["gamma"] + raw["beta"]
    h = jnp.maximum(h @ raw["w1"].T + raw["b1"], 0.0)   # fc1 + ReLU
    # dropout(0.2) is identity in eval mode
    h = jnp.maximum(h @ raw["w2"].T + raw["b2"], 0.0)   # fc2 + ReLU
    return h @ raw["w3"].T + raw["b3"]                   # fc3


if __name__ == "__main__":
    key = jax.random.PRNGKey(0)
    kx, kparam = jax.random.split(key)

    F = 512
    raw = init_raw_params(kparam, input_size=F)
    ref_fn = jax.jit(reference_forward)

    # 1) Small batch, single grid step, f32 weights (exact check).
    x8 = jax.random.normal(kx, (8, F), dtype=jnp.float32)
    kp_f32 = prepare_kernel_params(raw, weight_dtype=jnp.float32)
    out = jax.block_until_ready(tongue_model_forward(x8, kp_f32))
    ref = ref_fn(x8, raw)
    assert out.shape == (8, 2)
    assert jnp.allclose(out, ref, atol=1e-4, rtol=1e-4), "mismatch (f32, B=8)"

    # 2) Non-divisible batch: default tile policy gives a 2-step grid (tile=56)
    #    with an out-of-bounds tail block and no host-side padding copy.
    x100 = jax.random.normal(kx, (100, F), dtype=jnp.float32)
    out = jax.block_until_ready(tongue_model_forward(x100, kp_f32))
    ref = ref_fn(x100, raw)
    assert out.shape == (100, 2)
    assert jnp.allclose(out, ref, atol=1e-4, rtol=1e-4), "mismatch (f32, B=100)"

    # 3) bf16 activations + bf16 weights (halves x HBM traffic on v6e/v7x);
    #    f32 accumulation / bias / ReLU. Reference evaluated on the same
    #    bf16-rounded input for a fair tolerance.
    kp_bf16 = prepare_kernel_params(raw, weight_dtype=jnp.bfloat16)
    x100_bf = x100.astype(jnp.bfloat16)
    out_bf16 = jax.block_until_ready(tongue_model_forward(x100_bf, kp_bf16))
    ref_bf = ref_fn(x100_bf.astype(jnp.float32), raw)
    assert out_bf16.shape == (100, 2)
    assert jnp.allclose(out_bf16, ref_bf, atol=5e-2, rtol=5e-2), "mismatch (bf16)"

    print("KERNEL_OK")
</pallas_src>

<mosaic_0001>
module attributes {stable_mosaic.version = 11 : i64} {
  func.func @tongue_kernel(%arg0: i32, %arg1: memref<8x512xf32, #tpu.memory_space<vmem>>, %arg2: memref<512x128xf32, #tpu.memory_space<vmem>>, %arg3: memref<128x128xf32, #tpu.memory_space<vmem>>, %arg4: memref<128x8xf32, #tpu.memory_space<vmem>>, %arg5: memref<2x128xf32, #tpu.memory_space<vmem>>, %arg6: memref<1x8xf32, #tpu.memory_space<vmem>>, %arg7: memref<8x8xf32, #tpu.memory_space<vmem>>) attributes {dimension_semantics = [#tpu.dimension_semantics<parallel>], iteration_bounds = array<i64: 1>, scalar_prefetch = 0 : i64, scratch_operands = 0 : i64, tpu.core_type = #tpu.core_type<tc>, window_params = [{transform_indices = @transform_0, window_bounds = array<i64: 8, 512>}, {pipeline_mode = #tpu.pipeline_mode<synchronous>, transform_indices = @transform_1, window_bounds = array<i64: 512, 128>}, {pipeline_mode = #tpu.pipeline_mode<synchronous>, transform_indices = @transform_2, window_bounds = array<i64: 128, 128>}, {pipeline_mode = #tpu.pipeline_mode<synchronous>, transform_indices = @transform_3, window_bounds = array<i64: 128, 8>}, {pipeline_mode = #tpu.pipeline_mode<synchronous>, transform_indices = @transform_4, window_bounds = array<i64: 2, 128>}, {pipeline_mode = #tpu.pipeline_mode<synchronous>, transform_indices = @transform_5, window_bounds = array<i64: 1, 8>}, {transform_indices = @transform_6, window_bounds = array<i64: 8, 8>}]} {
    %c0 = arith.constant 0 : index
    %c0_0 = arith.constant 0 : index
    %0 = vector.load %arg1[%c0, %c0_0] : memref<8x512xf32, #tpu.memory_space<vmem>>, vector<8x512xf32>
    %c0_1 = arith.constant 0 : index
    %c0_2 = arith.constant 0 : index
    %1 = vector.load %arg2[%c0_1, %c0_2] : memref<512x128xf32, #tpu.memory_space<vmem>>, vector<512x128xf32>
    %cst = arith.constant dense<0.000000e+00> : vector<8x128xf32>
    %2 = tpu.matmul %0, %1, %cst {dimension_numbers = #tpu.dot_dimension_numbers<[1], [0], [0], [1], [0, 0, 1, 1], [], []>} : vector<8x512xf32>, vector<512x128xf32>, vector<8x128xf32> -> vector<8x128xf32>
    %c0_3 = arith.constant 0 : index
    %c0_4 = arith.constant 0 : index
    %3 = vector.load %arg5[%c0_3, %c0_4] : memref<2x128xf32, #tpu.memory_space<vmem>>, vector<1x128xf32>
    %4 = vector.broadcast %3 : vector<1x128xf32> to vector<8x128xf32>
    %5 = arith.addf %2, %4 : vector<8x128xf32>
    %cst_5 = arith.constant 0.000000e+00 : f32
    %6 = vector.broadcast %cst_5 : f32 to vector<8x128xf32>
    %7 = arith.maximumf %5, %6 : vector<8x128xf32>
    %c0_6 = arith.constant 0 : index
    %c0_7 = arith.constant 0 : index
    %8 = vector.load %arg3[%c0_6, %c0_7] : memref<128x128xf32, #tpu.memory_space<vmem>>, vector<128x128xf32>
    %cst_8 = arith.constant dense<0.000000e+00> : vector<8x128xf32>
    %9 = tpu.matmul %7, %8, %cst_8 {dimension_numbers = #tpu.dot_dimension_numbers<[1], [0], [0], [1], [0, 0, 1, 1], [], []>} : vector<8x128xf32>, vector<128x128xf32>, vector<8x128xf32> -> vector<8x128xf32>
    %c1 = arith.constant 1 : index
    %c0_9 = arith.constant 0 : index
    %10 = vector.load %arg5[%c1, %c0_9] : memref<2x128xf32, #tpu.memory_space<vmem>>, vector<1x128xf32>
    %11 = vector.broadcast %10 : vector<1x128xf32> to vector<8x128xf32>
    %12 = arith.addf %9, %11 : vector<8x128xf32>
    %cst_10 = arith.constant 0.000000e+00 : f32
    %13 = vector.broadcast %cst_10 : f32 to vector<8x128xf32>
    %14 = arith.maximumf %12, %13 : vector<8x128xf32>
    %c0_11 = arith.constant 0 : index
    %c0_12 = arith.constant 0 : index
    %15 = vector.load %arg4[%c0_11, %c0_12] : memref<128x8xf32, #tpu.memory_space<vmem>>, vector<128x8xf32>
    %cst_13 = arith.constant dense<0.000000e+00> : vector<8x8xf32>
    %16 = tpu.matmul %14, %15, %cst_13 {dimension_numbers = #tpu.dot_dimension_numbers<[1], [0], [0], [1], [0, 0, 1, 1], [], []>} : vector<8x128xf32>, vector<128x8xf32>, vector<8x8xf32> -> vector<8x8xf32>
    %c0_14 = arith.constant 0 : index
    %c0_15 = arith.constant 0 : index
    %17 = vector.load %arg6[%c0_14, %c0_15] : memref<1x8xf32, #tpu.memory_space<vmem>>, vector<1x8xf32>
    %18 = vector.broadcast %17 : vector<1x8xf32> to vector<8x8xf32>
    %19 = arith.addf %16, %18 : vector<8x8xf32>
    %c0_16 = arith.constant 0 : index
    %c0_17 = arith.constant 0 : index
    %20 = vector.load %arg7[%c0_16, %c0_17] : memref<8x8xf32, #tpu.memory_space<vmem>>, vector<8x8xf32>
    tpu.vector_store %arg7[%c0_16, %c0_17], %19 {strides = array<i32>} : memref<8x8xf32, #tpu.memory_space<vmem>>, vector<8x8xf32>,
    return
  }
  func.func @transform_0(%arg0: i32) -> (i32, i32) {
    %c0_i32 = arith.constant 0 : i32
    %c0_i32_0 = arith.constant 0 : i32
    return %arg0, %c0_i32 : i32, i32
  }
  func.func @transform_1(%arg0: i32) -> (i32, i32) {
    %c0_i32 = arith.constant 0 : i32
    %c0_i32_0 = arith.constant 0 : i32
    %c0_i32_1 = arith.constant 0 : i32
    return %c0_i32, %c0_i32_0 : i32, i32
  }
  func.func @transform_2(%arg0: i32) -> (i32, i32) {
    %c0_i32 = arith.constant 0 : i32
    %c0_i32_0 = arith.constant 0 : i32
    %c0_i32_1 = arith.constant 0 : i32
    return %c0_i32, %c0_i32_0 : i32, i32
  }
  func.func @transform_3(%arg0: i32) -> (i32, i32) {
    %c0_i32 = arith.constant 0 : i32
    %c0_i32_0 = arith.constant 0 : i32
    %c0_i32_1 = arith.constant 0 : i32
    return %c0_i32, %c0_i32_0 : i32, i32
  }
  func.func @transform_4(%arg0: i32) -> (i32, i32) {
    %c0_i32 = arith.constant 0 : i32
    %c0_i32_0 = arith.constant 0 : i32
    %c0_i32_1 = arith.constant 0 : i32
    return %c0_i32, %c0_i32_0 : i32, i32
  }
  func.func @transform_5(%arg0: i32) -> (i32, i32) {
    %c0_i32 = arith.constant 0 : i32
    %c0_i32_0 = arith.constant 0 : i32
    %c0_i32_1 = arith.constant 0 : i32
    return %c0_i32, %c0_i32_0 : i32, i32
  }
  func.func @transform_6(%arg0: i32) -> (i32, i32) {
    %c0_i32 = arith.constant 0 : i32
    %c0_i32_0 = arith.constant 0 : i32
    return %arg0, %c0_i32 : i32, i32
  }
}

</mosaic_0001>

<bundles_post_ra>
// kernel: tpu_custom_call.1
= control target key start
LH: loop header
LB: loop body
LE: loop exit
PB: predicated region body
PF: predicated region fallthrough
CT: control target
= control target key end

     0   :  { %11 = vsyncpa [#allocation3], 0  ;;  %s1043_s0 = inlined_call_operand.hbm [shape: f32[8,512], index: 0, kind: input, shape index: {}]   ;;  %s1044_s1 = inlined_call_operand.hbm [shape: f32[512,128], index: 1, kind: input, shape index: {}]   ;;  %s1045_s2 = inlined_call_operand.vmem [shape: f32[128,128], index: 2, kind: input, shape index: {}]   ;;  %s1046_s3 = inlined_call_operand.vmem [shape: f32[128,8], index: 3, kind: input, shape index: {}]   ;;  %s1047_s4 = inlined_call_operand.vmem [shape: f32[2,128], index: 4, kind: input, shape index: {}]   ;;  %s1048_s5 = inlined_call_operand.vmem [shape: f32[1,8], index: 5, kind: input, shape index: {}]   ;;  %s1049_s6 = inlined_call_operand.hbm [shape: f32[8,8], index: 6, kind: output, shape index: {}]  }
   0x1   :  { %12 = vsyncpa [#allocation6], 0 }
   0x2   :  { %13 = vsyncpa [#allocation4], 0  ;;  %s836_s21 = smov [#allocation2]   ;;  %s837_s23 = smov [#allocation5]  }
   0x3   :  { %s20_s22 = sshll.u32 %s836_s21, 4  ;;  %s29_s24 = sshll.u32 %s837_s23, 4  ;;  %s21_s22 = int_to_ptr.vmem [resolvable:$true] %s20_s22  ;;  %s879_s24 = int_to_ptr.vmem [resolvable:$true] %s29_s24 }
   0x4   :  { %s764_s27 = scalar_lea.hbm %s1043_s0, 512 }
   0x5   :  { %p765_p0 = scmp.ne.s32.totalorder %s1043_s0, %s764_s27  ;;  %p768_p1 = scmp.lt.u32.totalorder %s764_s27, %s1043_s0 }
   0x7   :  { %p770_p2 = pnand %p768_p1, %p765_p0 }
   0x9   :  { %773 = shalt.err (!%p770_p2)
}
   0xa   :  { %s774_s8 = scalar_lea.vmem %s21_s22, 512  ;;  %p779_p4 = scmp.lt.s32.totalorder %s21_s22, %s21_s22 }
   0xb   :  { %p775_p3 = scmp.ne.s32.totalorder %s21_s22, %s774_s8  ;;  %p780_p5 = scmp.lt.s32.totalorder %s774_s8, %s774_s8 }
   0xd   :  { %p781_p6 = por %p780_p5, %p779_p4 }
   0xf   :  { %p782_p7 = pnand %p781_p6, %p775_p3 }
  0x11   :  { %785 = shalt.err (!%p782_p7)
}
  0x12   :  { %23 = dma.hbm_to_vmem [thread:$0]  %s1043_s0, 512, %s21_s22, [#allocation3]  }
  0x13   :  { %s786_s13 = scalar_lea.hbm %s1044_s1, 8192 }
  0x14   :  { %p787_p8 = scmp.ne.s32.totalorder %s1044_s1, %s786_s13  ;;  %p790_p9 = scmp.lt.u32.totalorder %s786_s13, %s1044_s1 }
  0x16   :  { %p792_p10 = pnand %p790_p9, %p787_p8 }
  0x18   :  { %795 = shalt.err (!%p792_p10)
}
  0x19   :  { %s796_s18 = scalar_lea.vmem %s879_s24, 8192  ;;  %p801_p12 = scmp.lt.s32.totalorder %s879_s24, %s879_s24 }
  0x1a   :  { %p797_p11 = scmp.ne.s32.totalorder %s879_s24, %s796_s18  ;;  %p802_p13 = scmp.lt.s32.totalorder %s796_s18, %s796_s18 }
  0x1c   :  { %p803_p0 = por %p802_p13, %p801_p12 }
  0x1e   :  { %p804_p1 = pnand %p803_p0, %p797_p11 }
  0x20   :  { %807 = shalt.err (!%p804_p1)
}
  0x21   :  { %s838_s0 = smov 128   ;;  %s839_s19 = smov 8  }
  0x22   :  { %35 = dma.hbm_to_vmem [thread:$0]  %s1044_s1, 8192, %s879_s24, [#allocation6], %s838_s0, %s838_s0, %s839_s19  }
  0x23   :  { %830 = dma.done.wait [#allocation3], 512  }
  0x24   :  { %831 = vsyncadd [#allocation3], 4294966784 }
  0x25   :  { %832 = dma.done.wait [#allocation6], 8192  }
  0x26   :  { %833 = vsyncadd [#allocation6], 4294959104  ;;  %v70_v0 = vld [vmem:[#allocation5 + $0x80] sm:$0xff]  ;;  %v71_v1 = vld [vmem:[#allocation5 + $0x88] sm:$0xff]  ;;  %vm841_vm0 = vmmov 0   ;;  %s843_s13 = smov [#allocation7]  }
  0x27   :  { %v54_v2 = vld [vmem:[#allocation5] sm:$0xff]  ;;  %v644_v3 = vpack.c.bf16 %v71_v1, %v70_v0  ;;  %v55_v4 = vld [vmem:[#allocation5 + $0x8] sm:$0xff]  ;;  %v72_v11 = vld [vmem:[#allocation5 + $0x90] sm:$0xff]  ;;  %s457_s14 = sshll.u32 %s843_s13, 4  ;;  %vm449_vm1 = vcmask 64512   ;;  %s458_s14 = int_to_ptr.vmem [resolvable:$true] %s457_s14 }
  0x28   :  { %v102_v5 = vld [vmem:[#allocation5 + $0x180] sm:$0xff]  ;;  %v103_v6 = vld [vmem:[#allocation5 + $0x188] sm:$0xff]  ;;  %v646_v7 = vpack.c.bf16 %v55_v4, %v54_v2  ;;  %v73_v13 = vld [vmem:[#allocation5 + $0x98] sm:$0xff]  ;;  %p813_p3 = scmp.lt.s32.totalorder %s458_s14, %s458_s14 }
  0x29   :  { %v676_v8 = vpack.c.bf16 %v103_v6, %v102_v5  ;;  %v86_v9 = vld [vmem:[#allocation5 + $0x100] sm:$0xff]  ;;  %v87_v10 = vld [vmem:[#allocation5 + $0x108] sm:$0xff]  ;;  %645 = vmatprep.subr.bf16.mxu0 %v644_v3  ;;  %v56_v14 = vld [vmem:[#allocation5 + $0x10] sm:$0xff]  ;;  %v648_v16 = vpack.c.bf16 %v73_v13, %v72_v11 }
  0x2a   :  { %v678_v12 = vpack.c.bf16 %v87_v10, %v86_v9  ;;  %v57_v15 = vld [vmem:[#allocation5 + $0x18] sm:$0xff]  ;;  %647 = vmatpush3.bf16.msra.mxu0 %v646_v7  ;;  %v104_v18 = vld [vmem:[#allocation5 + $0x190] sm:$0xff]  ;;  %v74_v23 = vld [vmem:[#allocation5 + $0xa0] sm:$0xff] }
  0x2b   :  { %677 = vmatprep.subr.bf16.mxu1 %v676_v8  ;;  %v650_v17 = vpack.c.bf16 %v57_v15, %v56_v14  ;;  %v105_v19 = vld [vmem:[#allocation5 + $0x198] sm:$0xff]  ;;  %v88_v20 = vld [vmem:[#allocation5 + $0x110] sm:$0xff]  ;;  %v75_v24 = vld [vmem:[#allocation5 + $0xa8] sm:$0xff]  ;;  %649 = vmatprep.subr.bf16.mxu0 %v648_v16 }
  0x2c   :  { %679 = vmatpush3.bf16.msra.mxu1 %v678_v12  ;;  %v680_v21 = vpack.c.bf16 %v105_v19, %v104_v18  ;;  %v89_v22 = vld [vmem:[#allocation5 + $0x118] sm:$0xff]  ;;  %v652_v26 = vpack.c.bf16 %v75_v24, %v74_v23  ;;  %v58_v27 = vld [vmem:[#allocation5 + $0x20] sm:$0xff]  ;;  %v59_v28 = vld [vmem:[#allocation5 + $0x28] sm:$0xff] }
  0x2d   :  { %v682_v25 = vpack.c.bf16 %v89_v22, %v88_v20  ;;  %v106_v29 = vld [vmem:[#allocation5 + $0x1a0] sm:$0xff]  ;;  %v107_v30 = vld [vmem:[#allocation5 + $0x1a8] sm:$0xff]  ;;  %v654_v33 = vpack.c.bf16 %v59_v28, %v58_v27  ;;  %v76_v35 = vld [vmem:[#allocation5 + $0xb0] sm:$0xff] }
  0x2e   :  { %681 = vmatprep.subr.bf16.mxu1 %v680_v21  ;;  %v90_v31 = vld [vmem:[#allocation5 + $0x120] sm:$0xff]  ;;  %v91_v32 = vld [vmem:[#allocation5 + $0x128] sm:$0xff]  ;;  %651 = vmatpush3.bf16.msra.mxu0 %v650_v17  ;;  %v684_v34 = vpack.c.bf16 %v107_v30, %v106_v29  ;;  %v77_v36 = vld [vmem:[#allocation5 + $0xb8] sm:$0xff] }
  0x2f   :  { %v60_v37 = vld [vmem:[#allocation5 + $0x30] sm:$0xff]  ;;  %653 = vmatprep.subr.bf16.mxu0 %v652_v26  ;;  %v686_v38 = vpack.c.bf16 %v91_v32, %v90_v31  ;;  %v656_v39 = vpack.c.bf16 %v77_v36, %v76_v35  ;;  %v61_v40 = vld [vmem:[#allocation5 + $0x38] sm:$0xff]  ;;  %v78_v46 = vld [vmem:[#allocation5 + $0xc0] sm:$0xff] }
  0x30   :  { %683 = vmatpush3.bf16.msra.mxu1 %v682_v25  ;;  %v108_v41 = vld [vmem:[#allocation5 + $0x1b0] sm:$0xff]  ;;  %v109_v42 = vld [vmem:[#allocation5 + $0x1b8] sm:$0xff]  ;;  %v79_v47 = vld [vmem:[#allocation5 + $0xc8] sm:$0xff]  ;;  %v658_v48 = vpack.c.bf16 %v61_v40, %v60_v37 }
  0x31   :  { %685 = vmatprep.subr.bf16.mxu1 %v684_v34  ;;  %v688_v43 = vpack.c.bf16 %v109_v42, %v108_v41  ;;  %v92_v44 = vld [vmem:[#allocation5 + $0x130] sm:$0xff]  ;;  %v93_v45 = vld [vmem:[#allocation5 + $0x138] sm:$0xff]  ;;  %v110_v49 = vld [vmem:[#allocation5 + $0x1c0] sm:$0xff]  ;;  %v660_v52 = vpack.c.bf16 %v79_v47, %v78_v46 }
  0x32   :  { %655 = vmatpush3.bf16.msra.mxu0 %v654_v33  ;;  %v111_v50 = vld [vmem:[#allocation5 + $0x1c8] sm:$0xff]  ;;  %v690_v51 = vpack.c.bf16 %v93_v45, %v92_v44  ;;  %v62_v53 = vld [vmem:[#allocation5 + $0x40] sm:$0xff]  ;;  %v80_v58 = vld [vmem:[#allocation5 + $0xd0] sm:$0xff] }
  0x33   :  { %657 = vmatprep.subr.bf16.mxu0 %v656_v39  ;;  %v63_v54 = vld [vmem:[#allocation5 + $0x48] sm:$0xff]  ;;  %v94_v55 = vld [vmem:[#allocation5 + $0x140] sm:$0xff]  ;;  %v692_v56 = vpack.c.bf16 %v111_v50, %v110_v49  ;;  %v81_v59 = vld [vmem:[#allocation5 + $0xd8] sm:$0xff]  ;;  %v840_v39 = vmov 0.0|0.0  }
  0x34   :  { %687 = vmatpush3.bf16.msra.mxu1 %v686_v38  ;;  %v95_v57 = vld [vmem:[#allocation5 + $0x148] sm:$0xff]  ;;  %v112_v60 = vld [vmem:[#allocation5 + $0x1d0] sm:$0xff]  ;;  %v113_v61 = vld [vmem:[#allocation5 + $0x1d8] sm:$0xff]  ;;  %v662_v62 = vpack.c.bf16 %v63_v54, %v62_v53  ;;  %v664_v0 = vpack.c.bf16 %v81_v59, %v80_v58 }
  0x35   :  { %689 = vmatprep.subr.bf16.mxu1 %v688_v43  ;;  %v694_v63 = vpack.c.bf16 %v95_v57, %v94_v55  ;;  %v64_v1 = vld [vmem:[#allocation5 + $0x50] sm:$0xff]  ;;  %v65_v2 = vld [vmem:[#allocation5 + $0x58] sm:$0xff]  ;;  %v696_v4 = vpack.c.bf16 %v113_v61, %v112_v60  ;;  %v82_v6 = vld [vmem:[#allocation5 + $0xe0] sm:$0xff]  ;;  %v842_v61 = vmov 0.0  }
  0x36   :  { %659 = vmatpush3.bf16.msra.mxu0 %v658_v48  ;;  %v96_v3 = vld [vmem:[#allocation5 + $0x150] sm:$0xff]  ;;  %v97_v5 = vld [vmem:[#allocation5 + $0x158] sm:$0xff]  ;;  %v83_v7 = vld [vmem:[#allocation5 + $0xe8] sm:$0xff]  ;;  %v666_v10 = vpack.c.bf16 %v65_v2, %v64_v1 }
  0x37   :  { %661 = vmatprep.subr.bf16.mxu0 %v660_v52  ;;  %v114_v8 = vld [vmem:[#allocation5 + $0x1e0] sm:$0xff]  ;;  %v115_v9 = vld [vmem:[#allocation5 + $0x1e8] sm:$0xff]  ;;  %v698_v13 = vpack.c.bf16 %v97_v5, %v96_v3  ;;  %v668_v14 = vpack.c.bf16 %v83_v7, %v82_v6  ;;  %v84_v19 = vld [vmem:[#allocation5 + $0xf0] sm:$0xff] }
  0x38   :  { %691 = vmatpush3.bf16.msra.mxu1 %v690_v51  ;;  %v66_v11 = vld [vmem:[#allocation5 + $0x60] sm:$0xff]  ;;  %v67_v12 = vld [vmem:[#allocation5 + $0x68] sm:$0xff]  ;;  %v700_v18 = vpack.c.bf16 %v115_v9, %v114_v8  ;;  %v85_v20 = vld [vmem:[#allocation5 + $0xf8] sm:$0xff] }
  0x39   :  { %693 = vmatprep.subr.bf16.mxu1 %v692_v56  ;;  %v98_v15 = vld [vmem:[#allocation5 + $0x160] sm:$0xff]  ;;  %v99_v16 = vld [vmem:[#allocation5 + $0x168] sm:$0xff]  ;;  %v53_v21 = vld [vmem:[#allocation2 + $0x18] sm:$0xff]  ;;  %v670_v24 = vpack.c.bf16 %v67_v12, %v66_v11  ;;  %v672_v26 = vpack.c.bf16 %v85_v20, %v84_v19 }
  0x3a   :  { %663 = vmatpush3.bf16.msra.mxu0 %v662_v62  ;;  %v51_v17 = vld [vmem:[#allocation2 + $0x8] sm:$0xff]  ;;  %v116_v22 = vld [vmem:[#allocation5 + $0x1f0] sm:$0xff]  ;;  %v117_v23 = vld [vmem:[#allocation5 + $0x1f8] sm:$0xff]  ;;  %257 = vmatprep.mubr.f32.mxu1 %v53_v21  ;;  %v702_v25 = vpack.c.bf16 %v99_v16, %v98_v15 }
  0x3b   :  { %665 = vmatprep.subr.bf16.mxu0 %v664_v0  ;;  %187 = vmatprep.mubr.f32.mxu0 %v51_v17  ;;  %v68_v27 = vld [vmem:[#allocation5 + $0x70] sm:$0xff]  ;;  %v69_v28 = vld [vmem:[#allocation5 + $0x78] sm:$0xff]  ;;  %v704_v29 = vpack.c.bf16 %v117_v23, %v116_v22  ;;  %v264_v34 = vld [vmem:[%s1045_s2] sm:$0xff] }
  0x3c   :  { %695 = vmatpush3.bf16.msra.mxu1 %v694_v63  ;;  %v100_v30 = vld [vmem:[#allocation5 + $0x170] sm:$0xff]  ;;  %v101_v31 = vld [vmem:[#allocation5 + $0x178] sm:$0xff]  ;;  %v674_v32 = vpack.c.bf16 %v69_v28, %v68_v27  ;;  %v265_v35 = vld [vmem:[%s1045_s2 + $0x8] sm:$0xff] }
  0x3d   :  { %697 = vmatprep.subr.bf16.mxu1 %v696_v4  ;;  %v706_v33 = vpack.c.bf16 %v101_v31, %v100_v30  ;;  %v50_v36 = vld [vmem:[#allocation2] sm:$0xff]  ;;  %v709_v37 = vpack.c.bf16 %v265_v35, %v264_v34  ;;  %v52_v38 = vld [vmem:[#allocation2 + $0x10] sm:$0xff]  ;;  %v267_v41 = vld [vmem:[%s1045_s2 + $0x18] sm:$0xff] }
  0x3e   :  { %667 = vmatpush3.bf16.msra.mxu0 %v666_v10  ;;  %v266_v40 = vld [vmem:[%s1045_s2 + $0x10] sm:$0xff]  ;;  %v268_v43 = vld [vmem:[%s1045_s2 + $0x20] sm:$0xff]  ;;  %v269_v44 = vld [vmem:[%s1045_s2 + $0x28] sm:$0xff] }
  0x3f   :  { %669 = vmatprep.subr.bf16.mxu0 %v668_v14  ;;  %v712_v42 = vpack.c.bf16 %v267_v41, %v266_v40  ;;  %v715_v45 = vpack.c.bf16 %v269_v44, %v268_v43  ;;  %v270_v46 = vld [vmem:[%s1045_s2 + $0x30] sm:$0xff]  ;;  %v271_v47 = vld [vmem:[%s1045_s2 + $0x38] sm:$0xff]  ;;  %v272_v49 = vld [vmem:[%s1045_s2 + $0x40] sm:$0xff] }
  0x40   :  { %699 = vmatpush3.bf16.msra.mxu1 %v698_v13  ;;  %v718_v48 = vpack.c.bf16 %v271_v47, %v270_v46  ;;  %v273_v50 = vld [vmem:[%s1045_s2 + $0x48] sm:$0xff]  ;;  %v274_v52 = vld [vmem:[%s1045_s2 + $0x50] sm:$0xff]  ;;  %v275_v53 = vld [vmem:[%s1045_s2 + $0x58] sm:$0xff] }
  0x41   :  { %701 = vmatprep.subr.bf16.mxu1 %v700_v18  ;;  %v721_v51 = vpack.c.bf16 %v273_v50, %v272_v49  ;;  %v724_v54 = vpack.c.bf16 %v275_v53, %v274_v52  ;;  %v276_v55 = vld [vmem:[%s1045_s2 + $0x60] sm:$0xff]  ;;  %v277_v56 = vld [vmem:[%s1045_s2 + $0x68] sm:$0xff]  ;;  %v278_v58 = vld [vmem:[%s1045_s2 + $0x70] sm:$0xff] }
  0x42   :  { %671 = vmatpush3.bf16.msra.mxu0 %v670_v24  ;;  %v727_v57 = vpack.c.bf16 %v277_v56, %v276_v55  ;;  %v279_v59 = vld [vmem:[%s1045_s2 + $0x78] sm:$0xff]  ;;  %v356_v62 = vld [vmem:[%s1046_s3] sm:$0xff]  ;;  %v357_v63 = vld [vmem:[%s1046_s3 + $0x8] sm:$0xff] }
  0x43   :  { %673 = vmatprep.subr.bf16.mxu0 %v672_v26  ;;  %v730_v60 = vpack.c.bf16 %v279_v59, %v278_v58  ;;  %v358_v0 = vld [vmem:[%s1046_s3 + $0x10] sm:$0xff]  ;;  %v733_v1 = vpack.c.bf16 %v357_v63, %v356_v62  ;;  %v359_v2 = vld [vmem:[%s1046_s3 + $0x18] sm:$0xff]  ;;  %v360_v4 = vld [vmem:[%s1046_s3 + $0x20] sm:$0xff] }
  0x44   :  { %703 = vmatpush3.bf16.msra.mxu1 %v702_v25  ;;  %v736_v3 = vpack.c.bf16 %v359_v2, %v358_v0  ;;  %v361_v5 = vld [vmem:[%s1046_s3 + $0x28] sm:$0xff]  ;;  %v362_v7 = vld [vmem:[%s1046_s3 + $0x30] sm:$0xff]  ;;  %v363_v8 = vld [vmem:[%s1046_s3 + $0x38] sm:$0xff] }
  0x45   :  { %705 = vmatprep.subr.bf16.mxu1 %v704_v29  ;;  %v739_v6 = vpack.c.bf16 %v361_v5, %v360_v4  ;;  %v742_v9 = vpack.c.bf16 %v363_v8, %v362_v7  ;;  %v364_v10 = vld [vmem:[%s1046_s3 + $0x40] sm:$0xff]  ;;  %v365_v11 = vld [vmem:[%s1046_s3 + $0x48] sm:$0xff]  ;;  %v366_v13 = vld [vmem:[%s1046_s3 + $0x50] sm:$0xff] }
  0x46   :  { %675 = vmatpush3.bf16.msra.mxu0 %v674_v32  ;;  %v745_v12 = vpack.c.bf16 %v365_v11, %v364_v10  ;;  %v367_v14 = vld [vmem:[%s1046_s3 + $0x58] sm:$0xff]  ;;  %v368_v16 = vld [vmem:[%s1046_s3 + $0x60] sm:$0xff]  ;;  %v369_v17 = vld [vmem:[%s1046_s3 + $0x68] sm:$0xff] }
  0x47   :  { %708 = vmatprep.subr.bf16.mxu0 %v840_v39  ;;  %v748_v15 = vpack.c.bf16 %v367_v14, %v366_v13  ;;  %v751_v18 = vpack.c.bf16 %v369_v17, %v368_v16  ;;  %v467_v20 = vld [vmem:[%s1047_s4] ss:$0 sm:$0xff]  ;;  %v370_v29 = vld [vmem:[%s1046_s3 + $0x70] sm:$0xff]  ;;  %v371_v30 = vld [vmem:[%s1046_s3 + $0x78] sm:$0xff]  ;;  %s808_s3 = scalar_lea.vmem %s458_s14, 128 }
  0x48   :  { %707 = vmatpush3.bf16.msra.mxu1 %v706_v33  ;;  %v754_v31 = vpack.c.bf16 %v371_v30, %v370_v29  ;;  %v468_v32 = vld [vmem:[%s1047_s4 + $0x1] ss:$0 sm:$0xff]  ;;  %p809_p2 = scmp.ne.s32.totalorder %s458_s14, %s808_s3  ;;  %p814_p4 = scmp.lt.s32.totalorder %s808_s3, %s808_s3 }
  0x49   :  { %732 = vmatprep.subr.bf16.mxu1 %v840_v39  ;;  %188 = vmatmul.mubr.f32.vlgmr.msra.gmra.mrb[0].mxu0 %v50_v36 }
  0x4a   :  { %710 = vmatpush3.bf16.msra.mxu0 %v709_v37  ;;  %606 = vmatprep.mubr.msk.f32.mxu0 %vm841_vm0, %v842_v61  ;;  %v469_v37 = vld [vmem:[%s1048_s5] ss:$0 sm:$0xff]  ;;  %p815_p5 = por %p814_p4, %p813_p3 }
  0x4b   :  { %258 = vmatmul.mubr.f32.vlgmr.msra.gmra.mrb[0].mxu1 %v52_v38  ;;  %711 = vmatprep.subr.bf16.mxu0 %v840_v39 }
  0x4c   :  { %641 = vmatprep.mubr.msk.f32.mxu1 %vm841_vm0, %v842_v61  ;;  %734 = vmatpush3.bf16.msra.mxu1 %v733_v1  ;;  %p816_p6 = pnand %p815_p5, %p809_p2 }
  0x4d   :  { %735 = vmatprep.subr.bf16.mxu1 %v840_v39 }
  0x4e   :  { %713 = vmatpush3.bf16.msra.mxu0 %v712_v42 }
  0x4f   :  { %714 = vmatprep.subr.bf16.mxu0 %v840_v39 }
  0x50   :  { %737 = vmatpush3.bf16.msra.mxu1 %v736_v3 }
  0x51   :  { %738 = vmatprep.subr.bf16.mxu1 %v840_v39 }
  0x52   :  { %716 = vmatpush3.bf16.msra.mxu0 %v715_v45 }
  0x53   :  { %717 = vmatprep.subr.bf16.mxu0 %v840_v39 }
  0x54   :  { %740 = vmatpush3.bf16.msra.mxu1 %v739_v6 }
  0x55   :  { %741 = vmatprep.subr.bf16.mxu1 %v840_v39 }
  0x56   :  { %719 = vmatpush3.bf16.msra.mxu0 %v718_v48 }
  0x57   :  { %720 = vmatprep.subr.bf16.mxu0 %v840_v39 }
  0x58   :  { %743 = vmatpush3.bf16.msra.mxu1 %v742_v9 }
  0x59   :  { %744 = vmatprep.subr.bf16.mxu1 %v840_v39 }
  0x5a   :  { %722 = vmatpush3.bf16.msra.mxu0 %v721_v51 }
  0x5b   :  { %723 = vmatprep.subr.bf16.mxu0 %v840_v39 }
  0x5c   :  { %746 = vmatpush3.bf16.msra.mxu1 %v745_v12 }
  0x5d   :  { %747 = vmatprep.subr.bf16.mxu1 %v840_v39 }
  0x5e   :  { %725 = vmatpush3.bf16.msra.mxu0 %v724_v54 }
  0x5f   :  { %726 = vmatprep.subr.bf16.mxu0 %v840_v39 }
  0x60   :  { %749 = vmatpush3.bf16.msra.mxu1 %v748_v15 }
  0x61   :  { %750 = vmatprep.subr.bf16.mxu1 %v840_v39 }
  0x62   :  { %728 = vmatpush3.bf16.msra.mxu0 %v727_v57 }
  0x63   :  { %729 = vmatprep.subr.bf16.mxu0 %v840_v39 }
  0x64   :  { %752 = vmatpush3.bf16.msra.mxu1 %v751_v18 }
  0x65   :  { %753 = vmatprep.subr.bf16.mxu1 %v840_v39 }
  0x66   :  { %731 = vmatpush3.bf16.msra.mxu0 %v730_v60 }
  0x68   :  { %755 = vmatpush3.bf16.msra.mxu1 %v754_v31 }
 0x11c   :  { %v502_v19 = vpop.f32.mrb[0].mxu0 }
 0x11d   :  { %v503_v21 = vpop.f32.mrb[1].mxu0 }
 0x11e   :  { %v537_v22 = vpop.f32.mrb[0].mxu1  ;;  %v504_v23 = vadd.f32 %v503_v21, %v502_v19 }
 0x11f   :  { %v538_v24 = vpop.f32.mrb[1].mxu1 }
 0x120   :  { %v539_v25 = vadd.f32 %v538_v24, %v537_v22  ;;  %v190_v26 = vadd.f32 %v504_v23, %v467_v20 }
 0x122   :  { %v260_v27 = vadd.f32 %v539_v25, %v190_v26 }
 0x124   :  { %v263_v28 = vmax.f32 %v260_v27, 0.0 }
 0x126   :  { %607 = vmatmul.mubr.f32.vlgmr.msra.gmra.mrb[2].mxu0 %v263_v28 }
 0x1f9   :  { %v351_v33 = vpop.f32.mrb[2].mxu0 }
 0x1fa   :  { %v352_v34 = vadd.f32 %v468_v32, %v351_v33  ;;  %v608_v35 = vpop.f32.mrb[3].mxu0 }
 0x1fc   :  { %v355_v36 = vmax.f32 %v352_v34, 0.0 }
 0x1fe   :  { %642 = vmatmul.mubr.f32.vlgmr.msra.gmra.mrb[2].mxu1 %v355_v36 }
 0x2d1   :  { %v445_v38 = vpop.f32.mrb[2].mxu1 }
 0x2d2   :  { %v446_v39 = vadd.f32 %v469_v37, %v445_v38  ;;  %v643_v40 = vpop.f32.mrb[3].mxu1 }
 0x2d4   :  { %450 = vst.msk [vmem:[#allocation7] sm:$0xff] %vm449_vm1, %v446_v39 }
 0x2d5   :  { %819 = shalt.err (!%p816_p6)
}
 0x2d6   :  { %s820_s16 = scalar_lea.hbm %s1049_s6, 128 }
 0x2d7   :  { %p821_p7 = scmp.ne.s32.totalorder %s1049_s6, %s820_s16  ;;  %p824_p8 = scmp.lt.u32.totalorder %s820_s16, %s1049_s6 }
 0x2d9   :  { %p826_p9 = pnand %p824_p8, %p821_p7 }
 0x2db   :  { %829 = shalt.err (!%p826_p9)
}
 0x2dc   :  { %460 = dma.vmem_to_hbm [thread:$0]  %s458_s14, 128, %s1049_s6, [#allocation4]  }
 0x2dd   :  { %834 = dma.done.wait [#allocation4], 128  }
 0x2de   :  { %835 = vsyncadd [#allocation4], 4294967168 }
 0x2df   :  { %464 = vsyncpa [#allocation3], 1 }
 0x2e0   :  { %465 = vsyncpa [#allocation6], 1 }
 0x2e1   :  { %466 = vsyncpa [#allocation4], 1 }

</bundles_post_ra>
